<compile_context>
chip_gen: v6e
topology: v6e:2x2x1
jax: 0.10.0
libtpu: 0.0.40
codegen_flags: <defaults>
</compile_context>

<pallas_src>
import jax
import jax.numpy as jnp
from jax.experimental import pallas as pl
from jax.experimental.pallas import tpu as pltpu


def coordatt_kernel(x_ref, whc_ref, wwc_ref, ws_ref,
                    ah_ref, aw_ref, eh_ref, ew_ref, o_ref):
    bt = x_ref.shape[0]                       # static batches per grid step

    # Weights / constants: loaded once per grid step (constant index_maps ->
    # resident across steps, no re-DMA).
    whc = whc_ref[...].astype(jnp.float32)    # (OUT, C)  = wh @ w1 (folded)
    wwc = wwc_ref[...].astype(jnp.float32)    # (OUT, C)  = ww @ w1 (folded)
    ws = ws_ref[...].astype(jnp.float32)      # (OUT, C)  shortcut 1x1 conv
    ah = ah_ref[...]                          # (HW, H)   mean-over-W pooling
    aw = aw_ref[...]                          # (HW, W)   mean-over-H pooling
    eh = eh_ref[...]                          # (H, HW)   gate_h -> flat expand
    ew = ew_ref[...]                          # (W, HW)   gate_w -> flat expand

    # Short static loop (bt <= 8); each iteration is independent lane-dense
    # MXU work on a (C, HW) slab.
    for b in range(bt):
        xb = x_ref[b].astype(jnp.float32)                                   # (C, HW)

        # Adaptive avg pools as matmuls (no (C,HW)->(C,H,W) relayout needed).
        zh = jnp.dot(xb, ah, preferred_element_type=jnp.float32)            # (C, H)
        zw = jnp.dot(xb, aw, preferred_element_type=jnp.float32)            # (C, W)

        # Gates with conv1 folded into conv_h / conv_w.
        gh = jax.nn.sigmoid(jnp.dot(whc, zh, preferred_element_type=jnp.float32))  # (OUT, H)
        gw = jax.nn.sigmoid(jnp.dot(wwc, zw, preferred_element_type=jnp.float32))  # (OUT, W)

        # Broadcast gates back onto the flat spatial axis via tiny matmuls:
        # ghf[o, h*W + w] = gh[o, h],  gwf[o, h*W + w] = gw[o, w].
        ghf = jnp.dot(gh, eh, preferred_element_type=jnp.float32)           # (OUT, HW)
        gwf = jnp.dot(gw, ew, preferred_element_type=jnp.float32)           # (OUT, HW)

        # Shortcut 1x1 conv as a single MXU matmul.
        xp = jnp.dot(ws, xb, preferred_element_type=jnp.float32)            # (OUT, HW)

        o_ref[b] = (xp * ghf * gwf).astype(o_ref.dtype)                     # lane-dense store


def coord_attention(x, w1, wh, ww, ws, *, bt=None,
                    vmem_limit_bytes=32 * 1024 * 1024):
    B, C, H, W = x.shape
    OUT = wh.shape[0]
    HW = H * W

    # Fold conv1 into the gate convs (exact: no nonlinearity between them).
    whc = (wh.astype(jnp.float32) @ w1.astype(jnp.float32))                 # (OUT, C)
    wwc = (ww.astype(jnp.float32) @ w1.astype(jnp.float32))                 # (OUT, C)

    # Constant pooling / expansion matrices (built once, tiny).
    l = jnp.arange(HW, dtype=jnp.int32)
    row = l // W                                                            # h of flat pos
    col = l % W                                                             # w of flat pos
    ah = (row[:, None] == jnp.arange(H)[None, :]).astype(jnp.float32) / W   # (HW, H)
    aw = (col[:, None] == jnp.arange(W)[None, :]).astype(jnp.float32) / H   # (HW, W)
    eh = (jnp.arange(H)[:, None] == row[None, :]).astype(jnp.float32)       # (H, HW)
    ew = (jnp.arange(W)[:, None] == col[None, :]).astype(jnp.float32)       # (W, HW)

    # Batches per grid step: as many as fit a conservative VMEM budget
    # (double-buffered x + out blocks), capped to keep the static unroll short.
    # For bigger shapes, raise vmem_limit_bytes (v5e/v6e: 128 MiB physical;
    # keep well under 64 MiB on v7x) and/or add a spatial grid axis.
    if bt is None:
        per_batch_bytes = 2 * (C + OUT) * HW * x.dtype.itemsize
        bt = max(1, min(B, 8, (6 * 1024 * 1024) // max(per_batch_bytes, 1)))
        while B % bt:
            bt -= 1

    x2 = x.reshape(B, C, HW)                                                # lane-dense input
    grid = (B // bt,)

    out2 = pl.pallas_call(
        coordatt_kernel,
        out_shape=jax.ShapeDtypeStruct((B, OUT, HW), x.dtype),
        grid=grid,
        in_specs=[
            pl.BlockSpec((bt, C, HW), lambda i: (i, 0, 0)),
            pl.BlockSpec((OUT, C), lambda i: (0, 0)),
            pl.BlockSpec((OUT, C), lambda i: (0, 0)),
            pl.BlockSpec((OUT, C), lambda i: (0, 0)),
            pl.BlockSpec((HW, H), lambda i: (0, 0)),
            pl.BlockSpec((HW, W), lambda i: (0, 0)),
            pl.BlockSpec((H, HW), lambda i: (0, 0)),
            pl.BlockSpec((W, HW), lambda i: (0, 0)),
        ],
        out_specs=pl.BlockSpec((bt, OUT, HW), lambda i: (i, 0, 0)),
        compiler_params=pltpu.CompilerParams(
            dimension_semantics=("parallel",),
            vmem_limit_bytes=vmem_limit_bytes,
        ),
    )(x2, whc, wwc, ws, ah, aw, eh, ew)

    return out2.reshape(B, OUT, H, W)


def ref_coord_attention(x, w1, wh, ww, ws):
    # pure-JAX reference matching the PyTorch forward exactly (unfolded weights)
    B, C, H, W = x.shape
    zh = x.mean(axis=3)                                   # (B, C, H)
    zw = x.mean(axis=2)                                   # (B, C, W)
    cat = jnp.concatenate([zh, zw], axis=2)               # (B, C, H+W)
    y = jnp.einsum("mc,bcl->bml", w1, cat)                # conv1 (k=1, no bias)
    fh, fw = y[:, :, :H], y[:, :, H:]
    gh = jax.nn.sigmoid(jnp.einsum("om,bml->bol", wh, fh))[..., None]        # (B,O,H,1)
    gw = jax.nn.sigmoid(jnp.einsum("om,bml->bol", ww, fw))[:, :, None, :]    # (B,O,1,W)
    xp = jnp.einsum("oc,bchw->bohw", ws, x)               # shortcut 1x1 conv
    return xp * gh * gw


if __name__ == "__main__":
    B, C_IN, C_OUT, H, W = 2, 4, 8, 16, 16
    REDUCTION = 32
    MID = max(1, C_IN // REDUCTION)

    key = jax.random.PRNGKey(0)
    kx, k1, k2, k3, k4 = jax.random.split(key, 5)

    x = jax.random.normal(kx, (B, C_IN, H, W), dtype=jnp.float32)

    # PyTorch module weight shapes (k=1 convs, squeezed).
    w1 = 0.5 * jax.random.normal(k1, (MID, C_IN), dtype=jnp.float32)     # conv1
    wh = 0.5 * jax.random.normal(k2, (C_OUT, MID), dtype=jnp.float32)    # conv_h
    ww = 0.5 * jax.random.normal(k3, (C_OUT, MID), dtype=jnp.float32)    # conv_w
    if C_IN != C_OUT:
        ws = 0.5 * jax.random.normal(k4, (C_OUT, C_IN), dtype=jnp.float32)  # shortcut conv
    else:
        ws = jnp.eye(C_IN, dtype=jnp.float32)                               # Identity shortcut

    out = coord_attention(x, w1, wh, ww, ws)
    out = jax.block_until_ready(out)

    ref = ref_coord_attention(x, w1, wh, ww, ws)
    assert out.shape == (B, C_OUT, H, W)
    assert jnp.allclose(out, ref, rtol=1e-5, atol=1e-5), "mismatch vs JAX reference"

    print("KERNEL_OK")
</pallas_src>

<mosaic_0001>
module attributes {stable_mosaic.version = 11 : i64} {
  func.func @coordatt_kernel(%arg0: i32, %arg1: memref<2x4x256xf32, #tpu.memory_space<vmem>>, %arg2: memref<8x4xf32, #tpu.memory_space<vmem>>, %arg3: memref<8x4xf32, #tpu.memory_space<vmem>>, %arg4: memref<8x4xf32, #tpu.memory_space<vmem>>, %arg5: memref<256x16xf32, #tpu.memory_space<vmem>>, %arg6: memref<256x16xf32, #tpu.memory_space<vmem>>, %arg7: memref<16x256xf32, #tpu.memory_space<vmem>>, %arg8: memref<16x256xf32, #tpu.memory_space<vmem>>, %arg9: memref<2x8x256xf32, #tpu.memory_space<vmem>>) attributes {dimension_semantics = [#tpu.dimension_semantics<parallel>], iteration_bounds = array<i64: 1>, scalar_prefetch = 0 : i64, scratch_operands = 0 : i64, tpu.core_type = #tpu.core_type<tc>, window_params = [{transform_indices = @transform_0, window_bounds = array<i64: 2, 4, 256>}, {pipeline_mode = #tpu.pipeline_mode<synchronous>, transform_indices = @transform_1, window_bounds = array<i64: 8, 4>}, {pipeline_mode = #tpu.pipeline_mode<synchronous>, transform_indices = @transform_2, window_bounds = array<i64: 8, 4>}, {pipeline_mode = #tpu.pipeline_mode<synchronous>, transform_indices = @transform_3, window_bounds = array<i64: 8, 4>}, {pipeline_mode = #tpu.pipeline_mode<synchronous>, transform_indices = @transform_4, window_bounds = array<i64: 256, 16>}, {pipeline_mode = #tpu.pipeline_mode<synchronous>, transform_indices = @transform_5, window_bounds = array<i64: 256, 16>}, {pipeline_mode = #tpu.pipeline_mode<synchronous>, transform_indices = @transform_6, window_bounds = array<i64: 16, 256>}, {pipeline_mode = #tpu.pipeline_mode<synchronous>, transform_indices = @transform_7, window_bounds = array<i64: 16, 256>}, {transform_indices = @transform_8, window_bounds = array<i64: 2, 8, 256>}]} {
    %c0 = arith.constant 0 : index
    %c0_0 = arith.constant 0 : index
    %0 = vector.load %arg2[%c0, %c0_0] : memref<8x4xf32, #tpu.memory_space<vmem>>, vector<8x4xf32>
    %c0_1 = arith.constant 0 : index
    %c0_2 = arith.constant 0 : index
    %1 = vector.load %arg3[%c0_1, %c0_2] : memref<8x4xf32, #tpu.memory_space<vmem>>, vector<8x4xf32>
    %c0_3 = arith.constant 0 : index
    %c0_4 = arith.constant 0 : index
    %2 = vector.load %arg4[%c0_3, %c0_4] : memref<8x4xf32, #tpu.memory_space<vmem>>, vector<8x4xf32>
    %c0_5 = arith.constant 0 : index
    %c0_6 = arith.constant 0 : index
    %3 = vector.load %arg5[%c0_5, %c0_6] : memref<256x16xf32, #tpu.memory_space<vmem>>, vector<256x16xf32>
    %c0_7 = arith.constant 0 : index
    %c0_8 = arith.constant 0 : index
    %4 = vector.load %arg6[%c0_7, %c0_8] : memref<256x16xf32, #tpu.memory_space<vmem>>, vector<256x16xf32>
    %c0_9 = arith.constant 0 : index
    %c0_10 = arith.constant 0 : index
    %5 = vector.load %arg7[%c0_9, %c0_10] : memref<16x256xf32, #tpu.memory_space<vmem>>, vector<16x256xf32>
    %c0_11 = arith.constant 0 : index
    %c0_12 = arith.constant 0 : index
    %6 = vector.load %arg8[%c0_11, %c0_12] : memref<16x256xf32, #tpu.memory_space<vmem>>, vector<16x256xf32>
    %c0_13 = arith.constant 0 : index
    %c0_14 = arith.constant 0 : index
    %c0_15 = arith.constant 0 : index
    %7 = vector.load %arg1[%c0_13, %c0_14, %c0_15] : memref<2x4x256xf32, #tpu.memory_space<vmem>>, vector<1x4x256xf32>
    %8 = vector.shape_cast %7 : vector<1x4x256xf32> to vector<4x256xf32>
    %cst = arith.constant dense<0.000000e+00> : vector<4x16xf32>
    %9 = tpu.matmul %8, %3, %cst {dimension_numbers = #tpu.dot_dimension_numbers<[1], [0], [0], [1], [0, 0, 1, 1], [], []>} : vector<4x256xf32>, vector<256x16xf32>, vector<4x16xf32> -> vector<4x16xf32>
    %cst_16 = arith.constant dense<0.000000e+00> : vector<4x16xf32>
    %10 = tpu.matmul %8, %4, %cst_16 {dimension_numbers = #tpu.dot_dimension_numbers<[1], [0], [0], [1], [0, 0, 1, 1], [], []>} : vector<4x256xf32>, vector<256x16xf32>, vector<4x16xf32> -> vector<4x16xf32>
    %cst_17 = arith.constant dense<0.000000e+00> : vector<8x16xf32>
    %11 = tpu.matmul %0, %9, %cst_17 {dimension_numbers = #tpu.dot_dimension_numbers<[1], [0], [0], [1], [0, 0, 1, 1], [], []>} : vector<8x4xf32>, vector<4x16xf32>, vector<8x16xf32> -> vector<8x16xf32>
    %12 = arith.negf %11 : vector<8x16xf32>
    %13 = math.exp %12 : vector<8x16xf32>
    %cst_18 = arith.constant 1.000000e+00 : f32
    %14 = vector.broadcast %cst_18 : f32 to vector<8x16xf32>
    %15 = arith.addf %14, %13 : vector<8x16xf32>
    %16 = arith.divf %14, %15 : vector<8x16xf32>
    %cst_19 = arith.constant dense<0.000000e+00> : vector<8x16xf32>
    %17 = tpu.matmul %1, %10, %cst_19 {dimension_numbers = #tpu.dot_dimension_numbers<[1], [0], [0], [1], [0, 0, 1, 1], [], []>} : vector<8x4xf32>, vector<4x16xf32>, vector<8x16xf32> -> vector<8x16xf32>
    %18 = arith.negf %17 : vector<8x16xf32>
    %19 = math.exp %18 : vector<8x16xf32>
    %cst_20 = arith.constant 1.000000e+00 : f32
    %20 = vector.broadcast %cst_20 : f32 to vector<8x16xf32>
    %21 = arith.addf %20, %19 : vector<8x16xf32>
    %22 = arith.divf %20, %21 : vector<8x16xf32>
    %cst_21 = arith.constant dense<0.000000e+00> : vector<8x256xf32>
    %23 = tpu.matmul %16, %5, %cst_21 {dimension_numbers = #tpu.dot_dimension_numbers<[1], [0], [0], [1], [0, 0, 1, 1], [], []>} : vector<8x16xf32>, vector<16x256xf32>, vector<8x256xf32> -> vector<8x256xf32>
    %cst_22 = arith.constant dense<0.000000e+00> : vector<8x256xf32>
    %24 = tpu.matmul %22, %6, %cst_22 {dimension_numbers = #tpu.dot_dimension_numbers<[1], [0], [0], [1], [0, 0, 1, 1], [], []>} : vector<8x16xf32>, vector<16x256xf32>, vector<8x256xf32> -> vector<8x256xf32>
    %cst_23 = arith.constant dense<0.000000e+00> : vector<8x256xf32>
    %25 = tpu.matmul %2, %8, %cst_23 {dimension_numbers = #tpu.dot_dimension_numbers<[1], [0], [0], [1], [0, 0, 1, 1], [], []>} : vector<8x4xf32>, vector<4x256xf32>, vector<8x256xf32> -> vector<8x256xf32>
    %26 = arith.mulf %25, %23 : vector<8x256xf32>
    %27 = arith.mulf %26, %24 : vector<8x256xf32>
    %c0_24 = arith.constant 0 : index
    %c0_25 = arith.constant 0 : index
    %c0_26 = arith.constant 0 : index
    %28 = vector.load %arg9[%c0_24, %c0_25, %c0_26] : memref<2x8x256xf32, #tpu.memory_space<vmem>>, vector<1x8x256xf32>
    %29 = vector.shape_cast %28 : vector<1x8x256xf32> to vector<8x256xf32>
    %30 = vector.shape_cast %27 : vector<8x256xf32> to vector<1x8x256xf32>
    tpu.vector_store %arg9[%c0_24, %c0_25, %c0_26], %30 {strides = array<i32>} : memref<2x8x256xf32, #tpu.memory_space<vmem>>, vector<1x8x256xf32>,
    %c1 = arith.constant 1 : index
    %c0_27 = arith.constant 0 : index
    %c0_28 = arith.constant 0 : index
    %31 = vector.load %arg1[%c1, %c0_27, %c0_28] : memref<2x4x256xf32, #tpu.memory_space<vmem>>, vector<1x4x256xf32>
    %32 = vector.shape_cast %31 : vector<1x4x256xf32> to vector<4x256xf32>
    %cst_29 = arith.constant dense<0.000000e+00> : vector<4x16xf32>
    %33 = tpu.matmul %32, %3, %cst_29 {dimension_numbers = #tpu.dot_dimension_numbers<[1], [0], [0], [1], [0, 0, 1, 1], [], []>} : vector<4x256xf32>, vector<256x16xf32>, vector<4x16xf32> -> vector<4x16xf32>
    %cst_30 = arith.constant dense<0.000000e+00> : vector<4x16xf32>
    %34 = tpu.matmul %32, %4, %cst_30 {dimension_numbers = #tpu.dot_dimension_numbers<[1], [0], [0], [1], [0, 0, 1, 1], [], []>} : vector<4x256xf32>, vector<256x16xf32>, vector<4x16xf32> -> vector<4x16xf32>
    %cst_31 = arith.constant dense<0.000000e+00> : vector<8x16xf32>
    %35 = tpu.matmul %0, %33, %cst_31 {dimension_numbers = #tpu.dot_dimension_numbers<[1], [0], [0], [1], [0, 0, 1, 1], [], []>} : vector<8x4xf32>, vector<4x16xf32>, vector<8x16xf32> -> vector<8x16xf32>
    %36 = arith.negf %35 : vector<8x16xf32>
    %37 = math.exp %36 : vector<8x16xf32>
    %cst_32 = arith.constant 1.000000e+00 : f32
    %38 = vector.broadcast %cst_32 : f32 to vector<8x16xf32>
    %39 = arith.addf %38, %37 : vector<8x16xf32>
    %40 = arith.divf %38, %39 : vector<8x16xf32>
    %cst_33 = arith.constant dense<0.000000e+00> : vector<8x16xf32>
    %41 = tpu.matmul %1, %34, %cst_33 {dimension_numbers = #tpu.dot_dimension_numbers<[1], [0], [0], [1], [0, 0, 1, 1], [], []>} : vector<8x4xf32>, vector<4x16xf32>, vector<8x16xf32> -> vector<8x16xf32>
    %42 = arith.negf %41 : vector<8x16xf32>
    %43 = math.exp %42 : vector<8x16xf32>
    %cst_34 = arith.constant 1.000000e+00 : f32
    %44 = vector.broadcast %cst_34 : f32 to vector<8x16xf32>
    %45 = arith.addf %44, %43 : vector<8x16xf32>
    %46 = arith.divf %44, %45 : vector<8x16xf32>
    %cst_35 = arith.constant dense<0.000000e+00> : vector<8x256xf32>
    %47 = tpu.matmul %40, %5, %cst_35 {dimension_numbers = #tpu.dot_dimension_numbers<[1], [0], [0], [1], [0, 0, 1, 1], [], []>} : vector<8x16xf32>, vector<16x256xf32>, vector<8x256xf32> -> vector<8x256xf32>
    %cst_36 = arith.constant dense<0.000000e+00> : vector<8x256xf32>
    %48 = tpu.matmul %46, %6, %cst_36 {dimension_numbers = #tpu.dot_dimension_numbers<[1], [0], [0], [1], [0, 0, 1, 1], [], []>} : vector<8x16xf32>, vector<16x256xf32>, vector<8x256xf32> -> vector<8x256xf32>
    %cst_37 = arith.constant dense<0.000000e+00> : vector<8x256xf32>
    %49 = tpu.matmul %2, %32, %cst_37 {dimension_numbers = #tpu.dot_dimension_numbers<[1], [0], [0], [1], [0, 0, 1, 1], [], []>} : vector<8x4xf32>, vector<4x256xf32>, vector<8x256xf32> -> vector<8x256xf32>
    %50 = arith.mulf %49, %47 : vector<8x256xf32>
    %51 = arith.mulf %50, %48 : vector<8x256xf32>
    %c1_38 = arith.constant 1 : index
    %c0_39 = arith.constant 0 : index
    %c0_40 = arith.constant 0 : index
    %52 = vector.load %arg9[%c1_38, %c0_39, %c0_40] : memref<2x8x256xf32, #tpu.memory_space<vmem>>, vector<1x8x256xf32>
    %53 = vector.shape_cast %52 : vector<1x8x256xf32> to vector<8x256xf32>
    %54 = vector.shape_cast %51 : vector<8x256xf32> to vector<1x8x256xf32>
    tpu.vector_store %arg9[%c1_38, %c0_39, %c0_40], %54 {strides = array<i32>} : memref<2x8x256xf32, #tpu.memory_space<vmem>>, vector<1x8x256xf32>,
    return
  }
  func.func @transform_0(%arg0: i32) -> (i32, i32, i32) {
    %c0_i32 = arith.constant 0 : i32
    %c0_i32_0 = arith.constant 0 : i32
    %c0_i32_1 = arith.constant 0 : i32
    return %arg0, %c0_i32, %c0_i32_0 : i32, i32, i32
  }
  func.func @transform_1(%arg0: i32) -> (i32, i32) {
    %c0_i32 = arith.constant 0 : i32
    %c0_i32_0 = arith.constant 0 : i32
    %c0_i32_1 = arith.constant 0 : i32
    return %c0_i32, %c0_i32_0 : i32, i32
  }
  func.func @transform_2(%arg0: i32) -> (i32, i32) {
    %c0_i32 = arith.constant 0 : i32
    %c0_i32_0 = arith.constant 0 : i32
    %c0_i32_1 = arith.constant 0 : i32
    return %c0_i32, %c0_i32_0 : i32, i32
  }
  func.func @transform_3(%arg0: i32) -> (i32, i32) {
    %c0_i32 = arith.constant 0 : i32
    %c0_i32_0 = arith.constant 0 : i32
    %c0_i32_1 = arith.constant 0 : i32
    return %c0_i32, %c0_i32_0 : i32, i32
  }
  func.func @transform_4(%arg0: i32) -> (i32, i32) {
    %c0_i32 = arith.constant 0 : i32
    %c0_i32_0 = arith.constant 0 : i32
    %c0_i32_1 = arith.constant 0 : i32
    return %c0_i32, %c0_i32_0 : i32, i32
  }
  func.func @transform_5(%arg0: i32) -> (i32, i32) {
    %c0_i32 = arith.constant 0 : i32
    %c0_i32_0 = arith.constant 0 : i32
    %c0_i32_1 = arith.constant 0 : i32
    return %c0_i32, %c0_i32_0 : i32, i32
  }
  func.func @transform_6(%arg0: i32) -> (i32, i32) {
    %c0_i32 = arith.constant 0 : i32
    %c0_i32_0 = arith.constant 0 : i32
    %c0_i32_1 = arith.constant 0 : i32
    return %c0_i32, %c0_i32_0 : i32, i32
  }
  func.func @transform_7(%arg0: i32) -> (i32, i32) {
    %c0_i32 = arith.constant 0 : i32
    %c0_i32_0 = arith.constant 0 : i32
    %c0_i32_1 = arith.constant 0 : i32
    return %c0_i32, %c0_i32_0 : i32, i32
  }
  func.func @transform_8(%arg0: i32) -> (i32, i32, i32) {
    %c0_i32 = arith.constant 0 : i32
    %c0_i32_0 = arith.constant 0 : i32
    %c0_i32_1 = arith.constant 0 : i32
    return %arg0, %c0_i32, %c0_i32_0 : i32, i32, i32
  }
}

</mosaic_0001>

<bundles_post_ra>
// kernel: tpu_custom_call.1
= control target key start
LH: loop header
LB: loop body
LE: loop exit
PB: predicated region body
PF: predicated region fallthrough
CT: control target
= control target key end

     0   :  { %s2067_s0 = inlined_call_operand.vmem [shape: f32[2,4,256], index: 0, kind: input, shape index: {}]   ;;  %s2068_s1 = inlined_call_operand.vmem [shape: f32[8,4], index: 1, kind: input, shape index: {}]   ;;  %s2069_s2 = inlined_call_operand.vmem [shape: f32[8,4], index: 2, kind: input, shape index: {}]   ;;  %s2070_s3 = inlined_call_operand.vmem [shape: f32[8,4], index: 3, kind: input, shape index: {}]   ;;  %s2071_s4 = inlined_call_operand.vmem [shape: f32[256,16], index: 4, kind: input, shape index: {}]   ;;  %s2072_s5 = inlined_call_operand.vmem [shape: f32[256,16], index: 5, kind: input, shape index: {}]   ;;  %s2073_s6 = inlined_call_operand.vmem [shape: f32[16,256], index: 6, kind: input, shape index: {}]   ;;  %s2074_s7 = inlined_call_operand.vmem [shape: f32[16,256], index: 7, kind: input, shape index: {}]   ;;  %s2075_s8 = inlined_call_operand.hbm [shape: f32[2,8,256], index: 8, kind: output, shape index: {}]  }
   0x1   :  { %v1486_v0 = vld [vmem:[%s2071_s4 + $0xf8] sm:$0xff]  ;;  %v1508_v4 = vld [vmem:[%s2071_s4 + $0xf0] sm:$0xff]  ;;  %v1530_v8 = vld [vmem:[%s2071_s4 + $0xe8] sm:$0xff] }
   0x2   :  { %v1491_v1 = vld [vmem:[%s2072_s5 + $0xf8] sm:$0xff]  ;;  %1220 = vmatprep.subr.mxu0 %v1486_v0  ;;  %v1513_v5 = vld [vmem:[%s2072_s5 + $0xf0] sm:$0xff]  ;;  %v1537_v9 = vld [vmem:[%s2072_s5 + $0xe8] sm:$0xff] }
   0x3   :  { %v1496_v2 = vld [vmem:[%s2071_s4 + $0x78] sm:$0xff]  ;;  %1255 = vmatprep.subr.mxu1 %v1491_v1  ;;  %v1520_v6 = vld [vmem:[%s2071_s4 + $0x70] sm:$0xff]  ;;  %v1542_v10 = vld [vmem:[%s2071_s4 + $0x68] sm:$0xff] }
   0x4   :  { %v1503_v3 = vld [vmem:[%s2072_s5 + $0x78] sm:$0xff]  ;;  %1221 = vmatpush3.msra.mxu0 %v1496_v2  ;;  %v1525_v7 = vld [vmem:[%s2072_s5 + $0x70] sm:$0xff]  ;;  %v1547_v11 = vld [vmem:[%s2072_s5 + $0x68] sm:$0xff] }
   0x5   :  { %1256 = vmatpush3.msra.mxu1 %v1503_v3  ;;  %1222 = vmatprep.subr.mxu0 %v1508_v4  ;;  %v1554_v12 = vld [vmem:[%s2071_s4 + $0xe0] sm:$0xff]  ;;  %v1578_v16 = vld [vmem:[%s2071_s4 + $0xd8] sm:$0xff]  ;;  %v1602_v20 = vld [vmem:[%s2071_s4 + $0xd0] sm:$0xff] }
   0x6   :  { %1257 = vmatprep.subr.mxu1 %v1513_v5  ;;  %1223 = vmatpush3.msra.mxu0 %v1520_v6  ;;  %v1559_v13 = vld [vmem:[%s2072_s5 + $0xe0] sm:$0xff]  ;;  %v1583_v17 = vld [vmem:[%s2072_s5 + $0xd8] sm:$0xff]  ;;  %v1607_v21 = vld [vmem:[%s2072_s5 + $0xd0] sm:$0xff] }
   0x7   :  { %1258 = vmatpush3.msra.mxu1 %v1525_v7  ;;  %1224 = vmatprep.subr.mxu0 %v1530_v8  ;;  %v1566_v14 = vld [vmem:[%s2071_s4 + $0x60] sm:$0xff]  ;;  %v1590_v18 = vld [vmem:[%s2071_s4 + $0x58] sm:$0xff]  ;;  %v1614_v22 = vld [vmem:[%s2071_s4 + $0x50] sm:$0xff] }
   0x8   :  { %1259 = vmatprep.subr.mxu1 %v1537_v9  ;;  %v1571_v15 = vld [vmem:[%s2072_s5 + $0x60] sm:$0xff]  ;;  %1225 = vmatpush3.msra.mxu0 %v1542_v10  ;;  %v1595_v19 = vld [vmem:[%s2072_s5 + $0x58] sm:$0xff]  ;;  %v1619_v23 = vld [vmem:[%s2072_s5 + $0x50] sm:$0xff] }
   0x9   :  { %1260 = vmatpush3.msra.mxu1 %v1547_v11  ;;  %1226 = vmatprep.subr.mxu0 %v1554_v12  ;;  %v1626_v24 = vld [vmem:[%s2071_s4 + $0xc8] sm:$0xff]  ;;  %v1650_v28 = vld [vmem:[%s2071_s4 + $0xc0] sm:$0xff]  ;;  %v1674_v32 = vld [vmem:[%s2071_s4 + $0xb8] sm:$0xff] }
   0xa   :  { %1261 = vmatprep.subr.mxu1 %v1559_v13  ;;  %1227 = vmatpush3.msra.mxu0 %v1566_v14  ;;  %v1631_v25 = vld [vmem:[%s2072_s5 + $0xc8] sm:$0xff]  ;;  %v1655_v29 = vld [vmem:[%s2072_s5 + $0xc0] sm:$0xff]  ;;  %v1679_v33 = vld [vmem:[%s2072_s5 + $0xb8] sm:$0xff] }
   0xb   :  { %1262 = vmatpush3.msra.mxu1 %v1571_v15  ;;  %1228 = vmatprep.subr.mxu0 %v1578_v16  ;;  %v1638_v26 = vld [vmem:[%s2071_s4 + $0x48] sm:$0xff]  ;;  %v1662_v30 = vld [vmem:[%s2071_s4 + $0x40] sm:$0xff]  ;;  %v1686_v34 = vld [vmem:[%s2071_s4 + $0x38] sm:$0xff] }
   0xc   :  { %1263 = vmatprep.subr.mxu1 %v1583_v17  ;;  %1229 = vmatpush3.msra.mxu0 %v1590_v18  ;;  %v1643_v27 = vld [vmem:[%s2072_s5 + $0x48] sm:$0xff]  ;;  %v1667_v31 = vld [vmem:[%s2072_s5 + $0x40] sm:$0xff]  ;;  %v1691_v35 = vld [vmem:[%s2072_s5 + $0x38] sm:$0xff] }
   0xd   :  { %1264 = vmatpush3.msra.mxu1 %v1595_v19  ;;  %1230 = vmatprep.subr.mxu0 %v1602_v20  ;;  %v1698_v36 = vld [vmem:[%s2071_s4 + $0xb0] sm:$0xff]  ;;  %v1722_v40 = vld [vmem:[%s2071_s4 + $0xa8] sm:$0xff]  ;;  %v1746_v44 = vld [vmem:[%s2071_s4 + $0xa0] sm:$0xff] }
   0xe   :  { %1265 = vmatprep.subr.mxu1 %v1607_v21  ;;  %1231 = vmatpush3.msra.mxu0 %v1614_v22  ;;  %v1703_v37 = vld [vmem:[%s2072_s5 + $0xb0] sm:$0xff]  ;;  %v1727_v41 = vld [vmem:[%s2072_s5 + $0xa8] sm:$0xff]  ;;  %v1751_v45 = vld [vmem:[%s2072_s5 + $0xa0] sm:$0xff] }
   0xf   :  { %1266 = vmatpush3.msra.mxu1 %v1619_v23  ;;  %1232 = vmatprep.subr.mxu0 %v1626_v24  ;;  %v1710_v38 = vld [vmem:[%s2071_s4 + $0x30] sm:$0xff]  ;;  %v1734_v42 = vld [vmem:[%s2071_s4 + $0x28] sm:$0xff]  ;;  %v1758_v46 = vld [vmem:[%s2071_s4 + $0x20] sm:$0xff] }
  0x10   :  { %1267 = vmatprep.subr.mxu1 %v1631_v25  ;;  %1233 = vmatpush3.msra.mxu0 %v1638_v26  ;;  %v1715_v39 = vld [vmem:[%s2072_s5 + $0x30] sm:$0xff]  ;;  %v1739_v43 = vld [vmem:[%s2072_s5 + $0x28] sm:$0xff]  ;;  %v1763_v47 = vld [vmem:[%s2072_s5 + $0x20] sm:$0xff] }
  0x11   :  { %1268 = vmatpush3.msra.mxu1 %v1643_v27  ;;  %1234 = vmatprep.subr.mxu0 %v1650_v28  ;;  %2102 = vst [vmem:[#allocation5_spill] sm:$0xff] %v1763_v47 }
  0x12   :  { %1269 = vmatprep.subr.mxu1 %v1655_v29  ;;  %1235 = vmatpush3.msra.mxu0 %v1662_v30 }
  0x13   :  { %1270 = vmatpush3.msra.mxu1 %v1667_v31  ;;  %1236 = vmatprep.subr.mxu0 %v1674_v32 }
  0x14   :  { %1271 = vmatprep.subr.mxu1 %v1679_v33  ;;  %1237 = vmatpush3.msra.mxu0 %v1686_v34 }
  0x15   :  { %1272 = vmatpush3.msra.mxu1 %v1691_v35  ;;  %1238 = vmatprep.subr.mxu0 %v1698_v36 }
  0x16   :  { %1273 = vmatprep.subr.mxu1 %v1703_v37  ;;  %1239 = vmatpush3.msra.mxu0 %v1710_v38 }
  0x17   :  { %1274 = vmatpush3.msra.mxu1 %v1715_v39  ;;  %1240 = vmatprep.subr.mxu0 %v1722_v40 }
  0x18   :  { %1275 = vmatprep.subr.mxu1 %v1727_v41 }
  0x19   :  { %13 = vsyncpa [#allocation3], 0  ;;  %1241 = vmatpush3.msra.mxu0 %v1734_v42  ;;  %1276 = vmatpush3.msra.mxu1 %v1739_v43  ;;  %v1770_v48 = vld [vmem:[%s2071_s4 + $0x98] sm:$0xff]  ;;  %v1794_v52 = vld [vmem:[%s2071_s4 + $0x90] sm:$0xff]  ;;  %vm1434_vm0 = vmmov 0   ;;  %vm253_vm1 = vcmask 1043456  }
  0x1a   :  { %v1775_v49 = vld [vmem:[%s2072_s5 + $0x98] sm:$0xff]  ;;  %1242 = vmatprep.subr.mxu0 %v1746_v44  ;;  %1277 = vmatprep.subr.mxu1 %v1751_v45  ;;  %v1799_v53 = vld [vmem:[%s2072_s5 + $0x90] sm:$0xff]  ;;  %v1816_v56 = vld [vmem:[%s2067_s0] sm:$0xff]  ;;  %vm249_vm2 = vcmask 31744   ;;  %vm415_vm3 = vcmask 130048  }
  0x1b   :  { %2103 = vst [vmem:[#allocation6_spill] sm:$0xff] %v1775_v49  ;;  %v1782_v50 = vld [vmem:[%s2071_s4 + $0x18] sm:$0xff]  ;;  %1243 = vmatpush3.msra.mxu0 %v1758_v46  ;;  %1278 = vmatpush3.msra.mxu1 %v1763_v47  ;;  %2105 = vst [vmem:[#allocation8_spill] sm:$0xff] %v1799_v53  ;;  %v1806_v54 = vld [vmem:[%s2071_s4 + $0x10] sm:$0xff]  ;;  %v107_v63 = vcombine.high %v1816_v56, %v1816_v56 }
  0x1c   :  { %v1787_v51 = vld [vmem:[%s2072_s5 + $0x18] sm:$0xff]  ;;  %1244 = vmatprep.subr.mxu0 %v1770_v48  ;;  %1279 = vmatprep.subr.mxu1 %v1775_v49  ;;  %2106 = vst [vmem:[#allocation9_spill] sm:$0xff] %v1806_v54  ;;  %v1811_v55 = vld [vmem:[%s2072_s5 + $0x10] sm:$0xff]  ;;  %v1823_v57 = vld [vmem:[%s2071_s4 + $0x88] sm:$0xff] }
  0x1d   :  { %2104 = vst [vmem:[#allocation7_spill] sm:$0xff] %v1787_v51  ;;  %2107 = vst [vmem:[#allocation10_spill] sm:$0xff] %v1811_v55  ;;  %1245 = vmatpush3.msra.mxu0 %v1782_v50  ;;  %1280 = vmatpush3.msra.mxu1 %v1787_v51  ;;  %v1828_v58 = vld [vmem:[%s2072_s5 + $0x88] sm:$0xff]  ;;  %v1847_v61 = vld [vmem:[%s2071_s4 + $0x80] sm:$0xff] }
  0x1e   :  { %2108 = vst [vmem:[#allocation11_spill] sm:$0xff] %v1823_v57  ;;  %2109 = vst [vmem:[#allocation12_spill] sm:$0xff] %v1828_v58  ;;  %1246 = vmatprep.subr.mxu0 %v1794_v52  ;;  %1281 = vmatprep.subr.mxu1 %v1799_v53  ;;  %v1835_v59 = vld [vmem:[%s2071_s4 + $0x8] sm:$0xff]  ;;  %v1852_v62 = vld [vmem:[%s2072_s5 + $0x80] sm:$0xff] }
  0x1f   :  { %2110 = vst [vmem:[#allocation13_spill] sm:$0xff] %v1835_v59  ;;  %v1840_v60 = vld [vmem:[%s2072_s5 + $0x8] sm:$0xff]  ;;  %1247 = vmatpush3.msra.mxu0 %v1806_v54  ;;  %1282 = vmatpush3.msra.mxu1 %v1811_v55  ;;  %2112 = vst [vmem:[#allocation15_spill] sm:$0xff] %v1847_v61  ;;  %v1861_v55 = vld [vmem:[%s2071_s4] sm:$0xff] }
  0x20   :  { %2111 = vst [vmem:[#allocation14_spill] sm:$0xff] %v1840_v60  ;;  %2113 = vst [vmem:[#allocation16_spill] sm:$0xff] %v1852_v62  ;;  %1248 = vmatprep.subr.mxu0 %v1823_v57  ;;  %1283 = vmatprep.subr.mxu1 %v1828_v58  ;;  %v1868_v53 = vld [vmem:[%s2072_s5] sm:$0xff] }
  0x21   :  { %2114 = vst [vmem:[#allocation17_spill] sm:$0xff] %v1861_v55  ;;  %1249 = vmatpush3.msra.mxu0 %v1835_v59  ;;  %1284 = vmatpush3.msra.mxu1 %v1840_v60  ;;  %2115 = vst [vmem:[#allocation18_spill] sm:$0xff] %v1868_v53  ;;  %v2087_v60 = vmov 0.0   ;;  %v1885_v51 = vld [vmem:[%s2068_s1] sm:$0xff] }
  0x22   :  { %1250 = vmatprep.subr.mxu0 %v1847_v61  ;;  %1285 = vmatprep.subr.mxu1 %v1852_v62  ;;  %2116 = vst [vmem:[#allocation19_spill] sm:$0xff] %v1885_v51  ;;  %v1890_v57 = vld [vmem:[%s2069_s2] sm:$0xff] }
  0x23   :  { %1251 = vmatpush3.msra.mxu0 %v1861_v55  ;;  %173 = vmatprep.mubr.f32.mxu0 %v107_v63  ;;  %2117 = vst [vmem:[#allocation20_spill] sm:$0xff] %v1890_v57 }
  0x24   :  { %1286 = vmatpush3.msra.mxu1 %v1868_v53  ;;  %243 = vmatprep.mubr.f32.mxu1 %v107_v63 }
  0x25   :  { %174 = vmatmul.mubr.f32.vlgmr.msra.gmra.mxu0 %v1816_v56  ;;  %244 = vmatmul.mubr.f32.vlgmr.msra.gmra.mxu1 %v1816_v56 }
  0x26   :  { %1368 = vmatprep.subr.mxu0 %v2087_v60  ;;  %1373 = vmatprep.subr.mxu1 %v2087_v60 }
  0x27   :  { %1370 = vmatprep.mubr.msk.f32.mxu0 %vm1434_vm0, %v2087_v60  ;;  %1375 = vmatprep.mubr.msk.f32.mxu1 %vm1434_vm0, %v2087_v60 }
  0xe5   :  { %v1252_v62 = vpop.f32.mrf.mxu0  ;;  %v1287_v58 = vpop.f32.mrf.mxu1 }
  0xe7   :  { %v1253_v53 = vpop.f32.mrf.mxu0  ;;  %v1288_v55 = vpop.f32.mrf.mxu1 }
  0xe8   :  { %v1254_v61 = vadd.f32 %v1253_v53, %v1252_v62  ;;  %v1289_v59 = vadd.f32 %v1288_v55, %v1287_v58  ;;  %v1903_v53 = vld [vmem:[%s2074_s7 + $0x18] sm:$0xff]  ;;  %v1913_v58 = vld [vmem:[%s2074_s7 + $0x10] sm:$0xff]  ;;  %v1930_v62 = vld [vmem:[%s2073_s6 + $0x8] sm:$0xff] }
  0xe9   :  { %2118 = vst [vmem:[#allocation21_spill] sm:$0xff] %v1903_v53  ;;  %v1908_v55 = vld [vmem:[%s2073_s6 + $0x18] sm:$0xff]  ;;  %2120 = vst [vmem:[#allocation23_spill] sm:$0xff] %v1913_v58 }
  0xea   :  { %1369 = vmatpush3.msk.msra.mxu0 %vm253_vm1, %v1254_v61  ;;  %1374 = vmatpush3.msk.msra.mxu1 %vm253_vm1, %v1289_v59  ;;  %2119 = vst [vmem:[#allocation22_spill] sm:$0xff] %v1908_v55  ;;  %v1920_v59 = vld [vmem:[%s2073_s6 + $0x10] sm:$0xff]  ;;  %v1925_v61 = vld [vmem:[%s2074_s7 + $0x8] sm:$0xff]  ;;  %2123 = vst [vmem:[#allocation26_spill] sm:$0xff] %v1930_v62 }
  0xeb   :  { %1371 = vmatmul.mubr.msk.f32.vlgmr.msra.gmra.mxu0 %vm249_vm2, %v1885_v51  ;;  %1376 = vmatmul.mubr.msk.f32.vlgmr.msra.gmra.mxu1 %vm249_vm2, %v1890_v57  ;;  %2121 = vst [vmem:[#allocation24_spill] sm:$0xff] %v1920_v59  ;;  %2122 = vst [vmem:[#allocation25_spill] sm:$0xff] %v1925_v61 }
  0xec   :  { %483 = vmatprep.mubr.f32.mxu0 %v2087_v60  ;;  %557 = vmatprep.mubr.f32.mxu1 %v2087_v60  ;;  %v1937_v60 = vld [vmem:[%s2074_s7] sm:$0xff] }
  0xed   :  { %521 = vmatprep.subr.mxu1 %v1903_v53  ;;  %447 = vmatprep.subr.mxu0 %v1908_v55  ;;  %2124 = vst [vmem:[#allocation27_spill] sm:$0xff] %v1937_v60  ;;  %v1942_v53 = vld [vmem:[%s2073_s6] sm:$0xff] }
  0xee   :  { %522 = vmatpush1.msra.mxu1 %v1913_v58  ;;  %448 = vmatpush1.msra.mxu0 %v1920_v59  ;;  %2125 = vst [vmem:[#allocation28_spill] sm:$0xff] %v1942_v53 }
  0xef   :  { %523 = vmatprep.subr.mxu1 %v1925_v61  ;;  %449 = vmatprep.subr.mxu0 %v1930_v62 }
  0xf0   :  { %524 = vmatpush1.msra.mxu1 %v1937_v60  ;;  %450 = vmatpush1.msra.mxu0 %v1942_v53 }
  0xf1   :  { %1294 = vmatprep.subr.mxu1 %v1486_v0  ;;  %1205 = vmatprep.subr.msk.mxu0 %vm253_vm1, %v107_v63  ;;  %v1957_v0 = vld [vmem:[%s2070_s3] sm:$0xff] }
 0x1ab   :  { %v323_v58 = vpop.f32.mrf.mxu0  ;;  %v405_v57 = vpop.f32.mrf.mxu1 }
 0x1ac   :  { %v1199_v59 = vmul.f32 -1.442695, %v323_v58  ;;  %v1202_v55 = vmul.f32 -1.442695, %v405_v57 }
 0x1ad   :  { %v1372_v51 = vpop.f32.mrf.mxu0  ;;  %v1377_v49 = vpop.f32.mrf.mxu1 }
 0x1ae   :  { %1395 = vpow2.f32 %v1199_v59  ;;  %v2126_v49 = vmov 0.0  }
 0x1af   :  { %1397 = vpow2.f32 %v1202_v55 }
 0x1bb   :  { %v1396_v54 = vpop.eup %1395 }
 0x1bc   :  { %v1398_v61 = vpop.eup %1397  ;;  %v330_v47 = vadd.f32 1.0, %v1396_v54 }
 0x1bd   :  { %v412_v62 = vadd.f32 1.0, %v1398_v61 }
 0x1be   :  { %1399 = vrcp.f32 %v330_v47 }
 0x1bf   :  { %1401 = vrcp.f32 %v412_v62 }
 0x1cb   :  { %v1400_v60 = vpop.eup %1399 }
 0x1cc   :  { %v1402_v53 = vpop.eup %1401  ;;  %1203 = vmatmul.mubr.msk.f32.vlgmr.msra.gmra.mxu0 %vm415_vm3, %v1400_v60 }
 0x1cd   :  { %1204 = vmatmul.mubr.msk.f32.vlgmr.msra.gmra.mxu1 %vm415_vm3, %v1402_v53  ;;  %1206 = vmatpush1.msk.msra.mxu0 %vm253_vm1, %v1816_v56 }
 0x1ce   :  { %1295 = vmatpush3.msra.mxu1 %v1496_v2  ;;  %635 = vmatprep.mubr.f32.mxu0 %v2126_v49  ;;  %v2127_v2 = vld [vmem:[#allocation5_spill] sm:$0xff] }
 0x1cf   :  { %1296 = vmatprep.subr.mxu1 %v1508_v4  ;;  %1329 = vmatprep.subr.mxu0 %v1491_v1  ;;  %v2009_v1 = vld [vmem:[%s2067_s0 + $0x8] sm:$0xff]  ;;  %v2128_v4 = vld [vmem:[#allocation9_spill] sm:$0xff]  ;;  %s1435_s0 = smov [#allocation2]  }
 0x1d0   :  { %1297 = vmatpush3.msra.mxu1 %v1520_v6  ;;  %1207 = vmatmul.mubr.msk.f32.vlgmr.msra.gmra.mxu0 %vm249_vm2, %v1957_v0  ;;  %v2130_v6 = vld [vmem:[#allocation11_spill] sm:$0xff]  ;;  %s1186_s20 = sshll.u32 %s1435_s0, 4  ;;  %s1187_s20 = int_to_ptr.vmem [resolvable:$true] %s1186_s20 }
 0x1d1   :  { %1298 = vmatprep.subr.mxu1 %v1530_v8  ;;  %1330 = vmatpush3.msra.mxu0 %v1503_v3  ;;  %v651_v3 = vcombine.high %v2009_v1, %v2009_v1  ;;  %v2132_v8 = vld [vmem:[#allocation13_spill] sm:$0xff]  ;;  %s1411_s21 = scalar_lea.vmem %s1187_s20, 512  ;;  %p1416_p1 = scmp.lt.s32.totalorder %s1187_s20, %s1187_s20 }
 0x1d2   :  { %1299 = vmatpush3.msra.mxu1 %v1542_v10  ;;  %1331 = vmatprep.subr.mxu0 %v1513_v5  ;;  %v2129_v5 = vld [vmem:[#allocation6_spill] sm:$0xff]  ;;  %v2134_v10 = vld [vmem:[#allocation15_spill] sm:$0xff]  ;;  %p1412_p0 = scmp.ne.s32.totalorder %s1187_s20, %s1411_s21  ;;  %p1417_p2 = scmp.lt.s32.totalorder %s1411_s21, %s1411_s21 }
 0x1d3   :  { %1300 = vmatprep.subr.mxu1 %v1554_v12  ;;  %1332 = vmatpush3.msra.mxu0 %v1525_v7  ;;  %v2131_v7 = vld [vmem:[#allocation7_spill] sm:$0xff]  ;;  %v2136_v12 = vld [vmem:[#allocation10_spill] sm:$0xff] }
 0x1d4   :  { %1301 = vmatpush3.msra.mxu1 %v1566_v14  ;;  %1333 = vmatprep.subr.mxu0 %v1537_v9  ;;  %v2133_v9 = vld [vmem:[#allocation8_spill] sm:$0xff]  ;;  %v2138_v14 = vld [vmem:[#allocation14_spill] sm:$0xff]  ;;  %p1418_p3 = por %p1417_p2, %p1416_p1 }
 0x1d5   :  { %1302 = vmatprep.subr.mxu1 %v1578_v16  ;;  %1334 = vmatpush3.msra.mxu0 %v1547_v11  ;;  %v2135_v11 = vld [vmem:[#allocation17_spill] sm:$0xff]  ;;  %v2140_v16 = vld [vmem:[#allocation18_spill] sm:$0xff] }
 0x1d6   :  { %1303 = vmatpush3.msra.mxu1 %v1590_v18  ;;  %1335 = vmatprep.subr.mxu0 %v1559_v13  ;;  %v2137_v13 = vld [vmem:[#allocation12_spill] sm:$0xff]  ;;  %p1419_p4 = pnand %p1418_p3, %p1412_p0 }
 0x1d7   :  { %1304 = vmatprep.subr.mxu1 %v1602_v20  ;;  %1336 = vmatpush3.msra.mxu0 %v1571_v15  ;;  %v2139_v15 = vld [vmem:[#allocation16_spill] sm:$0xff] }
 0x1d8   :  { %1305 = vmatpush3.msra.mxu1 %v1614_v22  ;;  %1337 = vmatprep.subr.mxu0 %v1583_v17 }
 0x1d9   :  { %1306 = vmatprep.subr.mxu1 %v1626_v24  ;;  %1338 = vmatpush3.msra.mxu0 %v1595_v19 }
 0x1da   :  { %1307 = vmatpush3.msra.mxu1 %v1638_v26  ;;  %1339 = vmatprep.subr.mxu0 %v1607_v21 }
 0x1db   :  { %1308 = vmatprep.subr.mxu1 %v1650_v28  ;;  %1340 = vmatpush3.msra.mxu0 %v1619_v23 }
 0x1dc   :  { %1309 = vmatpush3.msra.mxu1 %v1662_v30  ;;  %1341 = vmatprep.subr.mxu0 %v1631_v25 }
 0x1dd   :  { %1310 = vmatprep.subr.mxu1 %v1674_v32  ;;  %1342 = vmatpush3.msra.mxu0 %v1643_v27  ;;  %v2141_v32 = vld [vmem:[#allocation19_spill] sm:$0xff] }
 0x1de   :  { %1311 = vmatpush3.msra.mxu1 %v1686_v34  ;;  %1343 = vmatprep.subr.mxu0 %v1655_v29 }
 0x1df   :  { %1312 = vmatprep.subr.mxu1 %v1698_v36  ;;  %1344 = vmatpush3.msra.mxu0 %v1667_v31  ;;  %v2144_v36 = vld [vmem:[#allocation26_spill] sm:$0xff] }
 0x1e0   :  { %1313 = vmatpush3.msra.mxu1 %v1710_v38  ;;  %1345 = vmatprep.subr.mxu0 %v1679_v33  ;;  %v2142_v33 = vld [vmem:[#allocation22_spill] sm:$0xff]  ;;  %v2146_v38 = vld [vmem:[#allocation20_spill] sm:$0xff] }
 0x1e1   :  { %1314 = vmatprep.subr.mxu1 %v1722_v40  ;;  %1346 = vmatpush3.msra.mxu0 %v1691_v35  ;;  %v2143_v35 = vld [vmem:[#allocation24_spill] sm:$0xff]  ;;  %v2148_v40 = vld [vmem:[#allocation23_spill] sm:$0xff] }
 0x1e2   :  { %1315 = vmatpush3.msra.mxu1 %v1734_v42  ;;  %1347 = vmatprep.subr.mxu0 %v1703_v37  ;;  %v2145_v37 = vld [vmem:[#allocation28_spill] sm:$0xff]  ;;  %v2150_v42 = vld [vmem:[#allocation27_spill] sm:$0xff] }
 0x1e3   :  { %1316 = vmatprep.subr.mxu1 %v1746_v44  ;;  %1348 = vmatpush3.msra.mxu0 %v1715_v39  ;;  %v2147_v39 = vld [vmem:[#allocation21_spill] sm:$0xff] }
 0x1e4   :  { %1317 = vmatpush3.msra.mxu1 %v1758_v46  ;;  %1349 = vmatprep.subr.mxu0 %v1727_v41  ;;  %v2149_v41 = vld [vmem:[#allocation25_spill] sm:$0xff] }
 0x1e5   :  { %1318 = vmatprep.subr.mxu1 %v1770_v48  ;;  %1350 = vmatpush3.msra.mxu0 %v1739_v43 }
 0x1e6   :  { %1319 = vmatpush3.msra.mxu1 %v1782_v50  ;;  %1351 = vmatprep.subr.mxu0 %v1751_v45 }
 0x1e7   :  { %1320 = vmatprep.subr.mxu1 %v1794_v52  ;;  %1352 = vmatpush3.msra.mxu0 %v2127_v2 }
 0x1e8   :  { %1321 = vmatpush3.msra.mxu1 %v2128_v4  ;;  %1353 = vmatprep.subr.mxu0 %v2129_v5 }
 0x1e9   :  { %1322 = vmatprep.subr.mxu1 %v2130_v6  ;;  %1354 = vmatpush3.msra.mxu0 %v2131_v7 }
 0x1ea   :  { %1323 = vmatpush3.msra.mxu1 %v2132_v8  ;;  %1355 = vmatprep.subr.mxu0 %v2133_v9 }
 0x1eb   :  { %1324 = vmatprep.subr.mxu1 %v2134_v10  ;;  %717 = vmatprep.mubr.f32.mxu1 %v651_v3 }
 0x1ec   :  { %1325 = vmatpush3.msra.mxu1 %v2135_v11  ;;  %1356 = vmatpush3.msra.mxu0 %v2136_v12 }
 0x1ed   :  { %718 = vmatmul.mubr.f32.vlgmr.msra.gmra.mxu1 %v2009_v1  ;;  %1357 = vmatprep.subr.mxu0 %v2137_v13 }
 0x1ee   :  { %1358 = vmatpush3.msra.mxu0 %v2138_v14  ;;  %787 = vmatprep.mubr.f32.mxu0 %v651_v3 }
 0x1ef   :  { %1359 = vmatprep.subr.mxu0 %v2139_v15  ;;  %1378 = vmatprep.subr.mxu1 %v2126_v49 }
 0x1f0   :  { %1360 = vmatpush3.msra.mxu0 %v2140_v16  ;;  %1380 = vmatprep.mubr.msk.f32.mxu1 %vm1434_vm0, %v2126_v49 }
 0x1f1   :  { %788 = vmatmul.mubr.f32.vlgmr.msra.gmra.mxu0 %v2009_v1  ;;  %1383 = vmatprep.subr.mxu0 %v2126_v49 }
 0x1f2   :  { %1385 = vmatprep.mubr.msk.f32.mxu0 %vm1434_vm0, %v2126_v49 }
 0x28c   :  { %v485_v17 = vpop.f32.mrf.mxu0 }
 0x28d   :  { %v559_v19 = vpop.f32.mrf.mxu1 }
 0x28e   :  { %v487_v18 = vpop.f32.mrf.mxu0 }
 0x28f   :  { %v561_v25 = vpop.f32.mrf.mxu1 }
 0x290   :  { %v637_v20 = vpop.f32.mrf.mxu0 }
 0x291   :  { %v642_v21 = vmul.f32 %v637_v20, %v485_v17 }
 0x292   :  { %v639_v22 = vpop.f32.mrf.mxu0 }
 0x293   :  { %v644_v23 = vmul.f32 %v642_v21, %v559_v19  ;;  %v643_v24 = vmul.f32 %v639_v22, %v487_v18 }
 0x295   :  { %646 = vst [vmem:[#allocation2] sm:$0xff] %v644_v23  ;;  %v645_v26 = vmul.f32 %v643_v24, %v561_v25 }
 0x297   :  { %647 = vst [vmem:[#allocation2 + $0x8] sm:$0xff] %v645_v26 }
 0x2ad   :  { %v1326_v27 = vpop.f32.mrf.mxu1 }
 0x2af   :  { %v1327_v28 = vpop.f32.mrf.mxu1 }
 0x2b0   :  { %v1328_v29 = vadd.f32 %v1327_v28, %v1326_v27 }
 0x2b1   :  { %v1361_v30 = vpop.f32.mrf.mxu0 }
 0x2b2   :  { %1379 = vmatpush3.msk.msra.mxu1 %vm253_vm1, %v1328_v29 }
 0x2b3   :  { %v1362_v31 = vpop.f32.mrf.mxu0  ;;  %1381 = vmatmul.mubr.msk.f32.vlgmr.msra.gmra.mxu1 %vm249_vm2, %v2141_v32  ;;  %982 = vmatprep.subr.mxu1 %v2142_v33 }
 0x2b4   :  { %v1363_v34 = vadd.f32 %v1362_v31, %v1361_v30  ;;  %983 = vmatpush1.msra.mxu1 %v2143_v35  ;;  %1018 = vmatprep.mubr.f32.mxu1 %v2126_v49 }
 0x2b5   :  { %984 = vmatprep.subr.mxu1 %v2144_v36 }
 0x2b6   :  { %1384 = vmatpush3.msk.msra.mxu0 %vm253_vm1, %v1363_v34  ;;  %985 = vmatpush1.msra.mxu1 %v2145_v37 }
 0x2b7   :  { %1386 = vmatmul.mubr.msk.f32.vlgmr.msra.gmra.mxu0 %vm249_vm2, %v2146_v38  ;;  %1056 = vmatprep.subr.mxu0 %v2147_v39 }
 0x2b8   :  { %1217 = vmatprep.subr.msk.mxu1 %vm253_vm1, %v651_v3  ;;  %1057 = vmatpush1.msra.mxu0 %v2148_v40 }
 0x2b9   :  { %1058 = vmatprep.subr.mxu0 %v2149_v41  ;;  %1092 = vmatprep.mubr.f32.mxu0 %v2126_v49 }
 0x2ba   :  { %1059 = vmatpush1.msra.mxu0 %v2150_v42 }
 0x373   :  { %v862_v43 = vpop.f32.mrf.mxu1 }
 0x374   :  { %v1211_v44 = vmul.f32 -1.442695, %v862_v43 }
 0x375   :  { %v1382_v45 = vpop.f32.mrf.mxu1 }
 0x376   :  { %1403 = vpow2.f32 %v1211_v44 }
 0x377   :  { %v941_v46 = vpop.f32.mrf.mxu0 }
 0x378   :  { %v1214_v47 = vmul.f32 -1.442695, %v941_v46 }
 0x379   :  { %v1387_v48 = vpop.f32.mrf.mxu0 }
 0x37a   :  { %1405 = vpow2.f32 %v1214_v47 }
 0x383   :  { %v1404_v50 = vpop.eup %1403 }
 0x384   :  { %v869_v51 = vadd.f32 1.0, %v1404_v50 }
 0x386   :  { %1407 = vrcp.f32 %v869_v51 }
 0x387   :  { %v1406_v52 = vpop.eup %1405 }
 0x388   :  { %v948_v54 = vadd.f32 1.0, %v1406_v52 }
 0x38a   :  { %1409 = vrcp.f32 %v948_v54 }
 0x393   :  { %v1408_v56 = vpop.eup %1407 }
 0x394   :  { %1215 = vmatmul.mubr.msk.f32.vlgmr.msra.gmra.mxu1 %vm415_vm3, %v1408_v56 }
 0x395   :  { %1218 = vmatpush1.msk.msra.mxu1 %vm253_vm1, %v2009_v1  ;;  %1167 = vmatprep.mubr.f32.mxu1 %v2126_v49 }
 0x397   :  { %v1410_v57 = vpop.eup %1409 }
 0x398   :  { %1219 = vmatmul.mubr.msk.f32.vlgmr.msra.gmra.mxu1 %vm249_vm2, %v1957_v0  ;;  %1216 = vmatmul.mubr.msk.f32.vlgmr.msra.gmra.mxu0 %vm415_vm3, %v1410_v57 }
 0x454   :  { %v1020_v60 = vpop.f32.mrf.mxu1 }
 0x456   :  { %v1022_v63 = vpop.f32.mrf.mxu1 }
 0x458   :  { %v1169_v53 = vpop.f32.mrf.mxu1  ;;  %v1094_v55 = vpop.f32.mrf.mxu0 }
 0x459   :  { %v1174_v58 = vmul.f32 %v1169_v53, %v1020_v60 }
 0x45a   :  { %v1171_v59 = vpop.f32.mrf.mxu1  ;;  %v1096_v2 = vpop.f32.mrf.mxu0 }
 0x45b   :  { %v1176_v61 = vmul.f32 %v1174_v58, %v1094_v55  ;;  %v1175_v62 = vmul.f32 %v1171_v59, %v1022_v63 }
 0x45d   :  { %1179 = vst [vmem:[#allocation2 + $0x10] sm:$0xff] %v1176_v61  ;;  %v1177_v49 = vmul.f32 %v1175_v62, %v1096_v2 }
 0x45f   :  { %1180 = vst [vmem:[#allocation2 + $0x18] sm:$0xff] %v1177_v49 }
 0x460   :  { %1422 = shalt.err (!%p1419_p4)
}
 0x461   :  { %s1436_s22 = smov 256   ;;  %s1437_s23 = smov 16  }
 0x462   :  { %1192 = dma.vmem_to_hbm [thread:$0]  %s1187_s20, 512, %s2075_s8, [#allocation3], %s1436_s22, %s1436_s22, %s1437_s23  }
 0x463   :  { %1431 = dma.done.wait [#allocation3], 512  }
 0x464   :  { %1432 = vsyncadd [#allocation3], 4294966784 }
 0x465   :  { %1196 = vsyncpa [#allocation3], 1 }

</bundles_post_ra>
